<compile_context>
chip_gen: v7x
topology: tpu7x:2x2x1
jax: 0.10.0
libtpu: 0.0.40
codegen_flags: <defaults>
</compile_context>

<pallas_src>
import math
import functools

import jax
import jax.numpy as jnp
import numpy as np
from jax.experimental import pallas as pl
from jax.experimental.pallas import tpu as pltpu


# ----------------------------- Pallas kernel --------------------------------

def _layernorm(x, gamma, beta, eps=1e-5):
    mean = jnp.mean(x, axis=-1, keepdims=True)
    var = jnp.mean((x - mean) ** 2, axis=-1, keepdims=True)
    return (x - mean) * jax.lax.rsqrt(var + eps) * gamma + beta


def fused_decode_kernel(x_ref, mask_ref,
                        wq_ref, wk_ref, wv_ref, bq_ref, bk_ref, bv_ref,
                        wo_ref, bo_ref, wl_ref, bl_ref,
                        g1_ref, be1_ref, g2_ref, be2_ref,
                        o_ref):
    # x_ref:    (N, E) with N = B*S   -- whole problem resident in VMEM
    # mask_ref: (N, N) additive mask  = user attn_mask tiled on the block diagonal,
    #                                   -1e9 on cross-batch entries.
    # w*_ref:   (L, E, E) pre-transposed weights;  b*/g*/be*: (L, 1, E) rows.
    x = x_ref[...]
    mask = mask_ref[...]
    E = x.shape[-1]
    scale = 1.0 / math.sqrt(E)                 # num_heads = 1 -> head_dim = E
    num_layers = wq_ref.shape[0]

    for l in range(num_layers):                # static unroll over decoder layers
        # ---- self-attention (single head) ----
        q = jnp.dot(x, wq_ref[l], preferred_element_type=jnp.float32) + bq_ref[l]
        k = jnp.dot(x, wk_ref[l], preferred_element_type=jnp.float32) + bk_ref[l]
        v = jnp.dot(x, wv_ref[l], preferred_element_type=jnp.float32) + bv_ref[l]

        scores = jnp.dot(q, k.T, preferred_element_type=jnp.float32) * scale + mask
        m = jnp.max(scores, axis=-1, keepdims=True)
        p = jnp.exp(scores - m)
        denom = jnp.sum(p, axis=-1, keepdims=True)
        ctx = jnp.dot(p, v, preferred_element_type=jnp.float32)
        # deferred softmax normalization; approx reciprocal runs on the EUP slot
        ctx = ctx * pl.reciprocal(denom, approx=True)

        attn_out = jnp.dot(ctx, wo_ref[l], preferred_element_type=jnp.float32) + bo_ref[l]

        # ---- residual + LayerNorm + Linear + residual + LayerNorm ----
        h = _layernorm(x + attn_out, g1_ref[l], be1_ref[l])
        y = jnp.dot(h, wl_ref[l], preferred_element_type=jnp.float32) + bl_ref[l]
        x = _layernorm(h + y, g2_ref[l], be2_ref[l])

    o_ref[...] = x.astype(o_ref.dtype)


# --------------------------- wrapper-side packing -----------------------------

def pack_layer_params(layers):
    """Stack per-layer PyTorch-layout params along a leading layer axis and
    pre-transpose / pre-split them so the kernel does no weight transposes."""
    E = layers[0][0].shape[1]
    stack = lambda i: jnp.stack([lp[i] for lp in layers])
    wqkv = stack(0)            # (L, 3E, E)  in_proj_weight
    bqkv = stack(1)            # (L, 1, 3E)  in_proj_bias
    wo, bo = stack(2), stack(3)
    wl, bl = stack(4), stack(5)
    g1, be1, g2, be2 = stack(6), stack(7), stack(8), stack(9)

    wq_t = jnp.transpose(wqkv[:, 0:E, :], (0, 2, 1))        # (L, E, E)
    wk_t = jnp.transpose(wqkv[:, E:2 * E, :], (0, 2, 1))
    wv_t = jnp.transpose(wqkv[:, 2 * E:3 * E, :], (0, 2, 1))
    bq = bqkv[:, :, 0:E]                                     # (L, 1, E)
    bk = bqkv[:, :, E:2 * E]
    bv = bqkv[:, :, 2 * E:3 * E]
    wo_t = jnp.transpose(wo, (0, 2, 1))
    wl_t = jnp.transpose(wl, (0, 2, 1))
    return (wq_t, wk_t, wv_t, bq, bk, bv, wo_t, bo, wl_t, bl, g1, be1, g2, be2)


def build_batched_mask(mask_ss, batch):
    """(S,S) additive attn_mask -> (B*S, B*S): attn_mask on the block diagonal,
    -1e9 for cross-batch pairs (keeps per-batch softmax semantics exactly)."""
    S = mask_ss.shape[0]
    N = batch * S
    bid = jnp.arange(N, dtype=jnp.int32) // S
    same_batch = bid[:, None] == bid[None, :]
    tiled = jnp.tile(mask_ss.astype(jnp.float32), (batch, batch))
    return jnp.where(same_batch, tiled, jnp.float32(-1e9))


def fused_decoder_stack(x_flat, full_mask, packed_params):
    """x_flat: (B*S, E) f32; full_mask: (B*S, B*S) f32. Single pallas_call,
    no grid: every operand is a whole-array VMEM ref (total working set ~30 KB)."""
    N, E = x_flat.shape
    return pl.pallas_call(
        fused_decode_kernel,
        out_shape=jax.ShapeDtypeStruct((N, E), jnp.float32),
    )(x_flat, full_mask, *packed_params)


# --------------------------- model glue (plain JAX) --------------------------

def positional_encoding_table(word_size, max_length):
    pos = jnp.arange(max_length, dtype=jnp.float32)[:, None]        # (L, 1)
    words = jnp.arange(word_size, dtype=jnp.float32)                 # (E,)
    mod2 = words % 2
    offset = math.pi * 0.5 * mod2
    x = pos * jnp.exp(-math.log(10000.0) * (words - mod2) / word_size)
    data = jnp.sin(x + offset)                                       # (L, E)
    return data[:, None, :]                                          # (L, 1, E)  batch_first=False


def init_params(key, num_words, word_dims, num_decoders):
    keys = jax.random.split(key, 1 + num_decoders)
    embedding = 0.02 * jax.random.normal(keys[0], (num_words, word_dims), jnp.float32)
    layers = []
    for i in range(num_decoders):
        ks = jax.random.split(keys[1 + i], 6)
        E = word_dims
        wqkv = 0.05 * jax.random.normal(ks[0], (3 * E, E), jnp.float32)   # in_proj_weight
        bqkv = 0.01 * jax.random.normal(ks[1], (1, 3 * E), jnp.float32)   # in_proj_bias
        wo = 0.05 * jax.random.normal(ks[2], (E, E), jnp.float32)         # out_proj.weight
        bo = 0.01 * jax.random.normal(ks[3], (1, E), jnp.float32)         # out_proj.bias
        wl = 0.05 * jax.random.normal(ks[4], (E, E), jnp.float32)         # linear.weight
        bl = 0.01 * jax.random.normal(ks[5], (1, E), jnp.float32)         # linear.bias
        g1 = jnp.ones((1, E), jnp.float32)
        be1 = jnp.zeros((1, E), jnp.float32)
        g2 = jnp.ones((1, E), jnp.float32)
        be2 = jnp.zeros((1, E), jnp.float32)
        layers.append((wqkv, bqkv, wo, bo, wl, bl, g1, be1, g2, be2))
    return embedding, layers


@jax.jit
def decode_part_forward(tokens_sb, mask_ss, embedding, pos_table, packed_params):
    # tokens_sb: (S, B) int32;  mask_ss: (S, S) float32 additive attention mask
    S, B = tokens_sb.shape
    E = embedding.shape[-1]
    x = embedding[tokens_sb]                          # (S, B, E) embedding lookup (glue)
    x = x + pos_table[:S]                             # positional encoding, batch_first=False
    x = jnp.transpose(x, (1, 0, 2)).reshape(B * S, E)  # (B*S, E) slab for the kernel
    full_mask = build_batched_mask(mask_ss, B)
    out = fused_decoder_stack(x, full_mask, packed_params)
    return jnp.transpose(out.reshape(B, S, E), (1, 0, 2))  # back to (S, B, E) like PyTorch


# ------------------------------ pure-JAX reference ---------------------------

def _layer_ref(x_bse, mask, lp):
    wqkv, bqkv, wo, bo, wl, bl, g1, be1, g2, be2 = lp
    E = x_bse.shape[-1]
    q = x_bse @ wqkv[0:E].T + bqkv[0, 0:E]
    k = x_bse @ wqkv[E:2 * E].T + bqkv[0, E:2 * E]
    v = x_bse @ wqkv[2 * E:].T + bqkv[0, 2 * E:]
    scores = jnp.einsum("bqe,bke->bqk", q, k) / math.sqrt(E) + mask
    attn = jax.nn.softmax(scores, axis=-1)
    ctx = jnp.einsum("bqk,bke->bqe", attn, v)
    attn_out = ctx @ wo.T + bo[0]
    h = _layernorm(x_bse + attn_out, g1[0], be1[0])
    out = _layernorm(h + (h @ wl.T + bl[0]), g2[0], be2[0])
    return out


def decode_part_ref(tokens_sb, mask, embedding, pos_table, layers):
    S, B = tokens_sb.shape
    x = embedding[tokens_sb] + pos_table[:S]
    x = jnp.transpose(x, (1, 0, 2))
    for lp in layers:
        x = _layer_ref(x, mask, lp)
    return jnp.transpose(x, (1, 0, 2))


# ------------------------------------ main -----------------------------------

if __name__ == "__main__":
    num_words = 50
    word_dims = 32
    seq_len = 8
    batch = 2
    num_decoders = 2
    num_heads = 1  # module default

    key = jax.random.PRNGKey(0)
    kparams, ktok = jax.random.split(key)

    embedding, layers = init_params(kparams, num_words, word_dims, num_decoders)
    pos_table = positional_encoding_table(word_dims, seq_len)
    packed_params = pack_layer_params(layers)     # stacked / pre-transposed once

    # token ids, shape (S, B) since batch_first=False
    tokens = jax.random.randint(ktok, (seq_len, batch), 0, num_words, dtype=jnp.int32)

    # causal additive attention mask (S, S): 0 where allowed, large negative elsewhere
    causal = jnp.tril(jnp.ones((seq_len, seq_len), dtype=bool))
    outs_mask = jnp.where(causal, 0.0, -1e9).astype(jnp.float32)

    out = decode_part_forward(tokens, outs_mask, embedding, pos_table, packed_params)
    out = jax.block_until_ready(out)

    ref = decode_part_ref(tokens, outs_mask, embedding, pos_table, layers)
    # tolerance accounts for the approx (EUP) reciprocal in the kernel's softmax
    np.testing.assert_allclose(np.asarray(out), np.asarray(ref), rtol=2e-3, atol=2e-3)

    print("KERNEL_OK")
</pallas_src>

<mosaic_0001>
module attributes {stable_mosaic.version = 11 : i64} {
  func.func @fused_decode_kernel(%arg0: memref<16x32xf32, #tpu.memory_space<vmem>>, %arg1: memref<16x16xf32, #tpu.memory_space<vmem>>, %arg2: memref<2x32x32xf32, #tpu.memory_space<vmem>>, %arg3: memref<2x32x32xf32, #tpu.memory_space<vmem>>, %arg4: memref<2x32x32xf32, #tpu.memory_space<vmem>>, %arg5: memref<2x1x32xf32, #tpu.memory_space<vmem>>, %arg6: memref<2x1x32xf32, #tpu.memory_space<vmem>>, %arg7: memref<2x1x32xf32, #tpu.memory_space<vmem>>, %arg8: memref<2x32x32xf32, #tpu.memory_space<vmem>>, %arg9: memref<2x1x32xf32, #tpu.memory_space<vmem>>, %arg10: memref<2x32x32xf32, #tpu.memory_space<vmem>>, %arg11: memref<2x1x32xf32, #tpu.memory_space<vmem>>, %arg12: memref<2x1x32xf32, #tpu.memory_space<vmem>>, %arg13: memref<2x1x32xf32, #tpu.memory_space<vmem>>, %arg14: memref<2x1x32xf32, #tpu.memory_space<vmem>>, %arg15: memref<2x1x32xf32, #tpu.memory_space<vmem>>, %arg16: memref<16x32xf32, #tpu.memory_space<vmem>>) attributes {dimension_semantics = [], scalar_prefetch = 0 : i64, scratch_operands = 0 : i64, tpu.core_type = #tpu.core_type<tc>} {
    %c0 = arith.constant 0 : index
    %c0_0 = arith.constant 0 : index
    %0 = vector.load %arg0[%c0, %c0_0] : memref<16x32xf32, #tpu.memory_space<vmem>>, vector<16x32xf32>
    %c0_1 = arith.constant 0 : index
    %c0_2 = arith.constant 0 : index
    %1 = vector.load %arg1[%c0_1, %c0_2] : memref<16x16xf32, #tpu.memory_space<vmem>>, vector<16x16xf32>
    %c0_3 = arith.constant 0 : index
    %c0_4 = arith.constant 0 : index
    %c0_5 = arith.constant 0 : index
    %2 = vector.load %arg2[%c0_3, %c0_4, %c0_5] : memref<2x32x32xf32, #tpu.memory_space<vmem>>, vector<1x32x32xf32>
    %3 = vector.shape_cast %2 : vector<1x32x32xf32> to vector<32x32xf32>
    %cst = arith.constant dense<0.000000e+00> : vector<16x32xf32>
    %4 = tpu.matmul %0, %3, %cst {dimension_numbers = #tpu.dot_dimension_numbers<[1], [0], [0], [1], [0, 0, 1, 1], [], []>} : vector<16x32xf32>, vector<32x32xf32>, vector<16x32xf32> -> vector<16x32xf32>
    %c0_6 = arith.constant 0 : index
    %c0_7 = arith.constant 0 : index
    %c0_8 = arith.constant 0 : index
    %5 = vector.load %arg5[%c0_6, %c0_7, %c0_8] : memref<2x1x32xf32, #tpu.memory_space<vmem>>, vector<1x1x32xf32>
    %6 = vector.shape_cast %5 : vector<1x1x32xf32> to vector<1x32xf32>
    %7 = vector.broadcast %6 : vector<1x32xf32> to vector<16x32xf32>
    %8 = arith.addf %4, %7 : vector<16x32xf32>
    %c0_9 = arith.constant 0 : index
    %c0_10 = arith.constant 0 : index
    %c0_11 = arith.constant 0 : index
    %9 = vector.load %arg3[%c0_9, %c0_10, %c0_11] : memref<2x32x32xf32, #tpu.memory_space<vmem>>, vector<1x32x32xf32>
    %10 = vector.shape_cast %9 : vector<1x32x32xf32> to vector<32x32xf32>
    %cst_12 = arith.constant dense<0.000000e+00> : vector<16x32xf32>
    %11 = tpu.matmul %0, %10, %cst_12 {dimension_numbers = #tpu.dot_dimension_numbers<[1], [0], [0], [1], [0, 0, 1, 1], [], []>} : vector<16x32xf32>, vector<32x32xf32>, vector<16x32xf32> -> vector<16x32xf32>
    %c0_13 = arith.constant 0 : index
    %c0_14 = arith.constant 0 : index
    %c0_15 = arith.constant 0 : index
    %12 = vector.load %arg6[%c0_13, %c0_14, %c0_15] : memref<2x1x32xf32, #tpu.memory_space<vmem>>, vector<1x1x32xf32>
    %13 = vector.shape_cast %12 : vector<1x1x32xf32> to vector<1x32xf32>
    %14 = vector.broadcast %13 : vector<1x32xf32> to vector<16x32xf32>
    %15 = arith.addf %11, %14 : vector<16x32xf32>
    %c0_16 = arith.constant 0 : index
    %c0_17 = arith.constant 0 : index
    %c0_18 = arith.constant 0 : index
    %16 = vector.load %arg4[%c0_16, %c0_17, %c0_18] : memref<2x32x32xf32, #tpu.memory_space<vmem>>, vector<1x32x32xf32>
    %17 = vector.shape_cast %16 : vector<1x32x32xf32> to vector<32x32xf32>
    %cst_19 = arith.constant dense<0.000000e+00> : vector<16x32xf32>
    %18 = tpu.matmul %0, %17, %cst_19 {dimension_numbers = #tpu.dot_dimension_numbers<[1], [0], [0], [1], [0, 0, 1, 1], [], []>} : vector<16x32xf32>, vector<32x32xf32>, vector<16x32xf32> -> vector<16x32xf32>
    %c0_20 = arith.constant 0 : index
    %c0_21 = arith.constant 0 : index
    %c0_22 = arith.constant 0 : index
    %19 = vector.load %arg7[%c0_20, %c0_21, %c0_22] : memref<2x1x32xf32, #tpu.memory_space<vmem>>, vector<1x1x32xf32>
    %20 = vector.shape_cast %19 : vector<1x1x32xf32> to vector<1x32xf32>
    %21 = vector.broadcast %20 : vector<1x32xf32> to vector<16x32xf32>
    %22 = arith.addf %18, %21 : vector<16x32xf32>
    %23 = tpu.transpose %15, [1, 0] : vector<16x32xf32> -> vector<32x16xf32>
    %cst_23 = arith.constant dense<0.000000e+00> : vector<16x16xf32>
    %24 = tpu.matmul %8, %23, %cst_23 {dimension_numbers = #tpu.dot_dimension_numbers<[1], [0], [0], [1], [0, 0, 1, 1], [], []>} : vector<16x32xf32>, vector<32x16xf32>, vector<16x16xf32> -> vector<16x16xf32>
    %cst_24 = arith.constant 0.176776692 : f32
    %25 = vector.broadcast %cst_24 : f32 to vector<16x16xf32>
    %26 = arith.mulf %24, %25 : vector<16x16xf32>
    %27 = arith.addf %26, %1 : vector<16x16xf32>
    %cst_25 = arith.constant dense<0xFF800000> : vector<16xf32>
    %28 = vector.multi_reduction <maximumf>, %27, %cst_25 [1] : vector<16x16xf32> to vector<16xf32>
    %29 = vector.shape_cast %28 : vector<16xf32> to vector<16x1xf32>
    %30 = vector.broadcast %29 : vector<16x1xf32> to vector<16x16xf32>
    %31 = arith.subf %27, %30 : vector<16x16xf32>
    %32 = math.exp %31 : vector<16x16xf32>
    %cst_26 = arith.constant dense<0.000000e+00> : vector<16xf32>
    %33 = vector.multi_reduction <add>, %32, %cst_26 [1] : vector<16x16xf32> to vector<16xf32>
    %34 = vector.shape_cast %33 : vector<16xf32> to vector<16x1xf32>
    %cst_27 = arith.constant dense<0.000000e+00> : vector<16x32xf32>
    %35 = tpu.matmul %32, %22, %cst_27 {dimension_numbers = #tpu.dot_dimension_numbers<[1], [0], [0], [1], [0, 0, 1, 1], [], []>} : vector<16x16xf32>, vector<16x32xf32>, vector<16x32xf32> -> vector<16x32xf32>
    %36 = tpu.reciprocal %34 {approx = true} : vector<16x1xf32> -> vector<16x1xf32>
    %37 = vector.broadcast %36 : vector<16x1xf32> to vector<16x32xf32>
    %38 = arith.mulf %35, %37 : vector<16x32xf32>
    %c0_28 = arith.constant 0 : index
    %c0_29 = arith.constant 0 : index
    %c0_30 = arith.constant 0 : index
    %39 = vector.load %arg8[%c0_28, %c0_29, %c0_30] : memref<2x32x32xf32, #tpu.memory_space<vmem>>, vector<1x32x32xf32>
    %40 = vector.shape_cast %39 : vector<1x32x32xf32> to vector<32x32xf32>
    %cst_31 = arith.constant dense<0.000000e+00> : vector<16x32xf32>
    %41 = tpu.matmul %38, %40, %cst_31 {dimension_numbers = #tpu.dot_dimension_numbers<[1], [0], [0], [1], [0, 0, 1, 1], [], []>} : vector<16x32xf32>, vector<32x32xf32>, vector<16x32xf32> -> vector<16x32xf32>
    %c0_32 = arith.constant 0 : index
    %c0_33 = arith.constant 0 : index
    %c0_34 = arith.constant 0 : index
    %42 = vector.load %arg9[%c0_32, %c0_33, %c0_34] : memref<2x1x32xf32, #tpu.memory_space<vmem>>, vector<1x1x32xf32>
    %43 = vector.shape_cast %42 : vector<1x1x32xf32> to vector<1x32xf32>
    %44 = vector.broadcast %43 : vector<1x32xf32> to vector<16x32xf32>
    %45 = arith.addf %41, %44 : vector<16x32xf32>
    %46 = arith.addf %0, %45 : vector<16x32xf32>
    %c0_35 = arith.constant 0 : index
    %c0_36 = arith.constant 0 : index
    %c0_37 = arith.constant 0 : index
    %47 = vector.load %arg12[%c0_35, %c0_36, %c0_37] : memref<2x1x32xf32, #tpu.memory_space<vmem>>, vector<1x1x32xf32>
    %48 = vector.shape_cast %47 : vector<1x1x32xf32> to vector<1x32xf32>
    %c0_38 = arith.constant 0 : index
    %c0_39 = arith.constant 0 : index
    %c0_40 = arith.constant 0 : index
    %49 = vector.load %arg13[%c0_38, %c0_39, %c0_40] : memref<2x1x32xf32, #tpu.memory_space<vmem>>, vector<1x1x32xf32>
    %50 = vector.shape_cast %49 : vector<1x1x32xf32> to vector<1x32xf32>
    %cst_41 = arith.constant dense<0.000000e+00> : vector<16xf32>
    %51 = vector.multi_reduction <add>, %46, %cst_41 [1] : vector<16x32xf32> to vector<16xf32>
    %52 = vector.shape_cast %51 : vector<16xf32> to vector<16x1xf32>
    %cst_42 = arith.constant 3.200000e+01 : f32
    %53 = vector.broadcast %cst_42 : f32 to vector<16x1xf32>
    %54 = arith.divf %52, %53 : vector<16x1xf32>
    %55 = vector.broadcast %54 : vector<16x1xf32> to vector<16x32xf32>
    %56 = arith.subf %46, %55 : vector<16x32xf32>
    %57 = arith.mulf %56, %56 : vector<16x32xf32>
    %cst_43 = arith.constant dense<0.000000e+00> : vector<16xf32>
    %58 = vector.multi_reduction <add>, %57, %cst_43 [1] : vector<16x32xf32> to vector<16xf32>
    %59 = vector.shape_cast %58 : vector<16xf32> to vector<16x1xf32>
    %cst_44 = arith.constant 3.200000e+01 : f32
    %60 = vector.broadcast %cst_44 : f32 to vector<16x1xf32>
    %61 = arith.divf %59, %60 : vector<16x1xf32>
    %62 = vector.broadcast %54 : vector<16x1xf32> to vector<16x32xf32>
    %63 = arith.subf %46, %62 : vector<16x32xf32>
    %cst_45 = arith.constant 9.99999974E-6 : f32
    %64 = vector.broadcast %cst_45 : f32 to vector<16x1xf32>
    %65 = arith.addf %61, %64 : vector<16x1xf32>
    %66 = math.rsqrt %65 : vector<16x1xf32>
    %67 = vector.broadcast %66 : vector<16x1xf32> to vector<16x32xf32>
    %68 = arith.mulf %63, %67 : vector<16x32xf32>
    %69 = vector.broadcast %48 : vector<1x32xf32> to vector<16x32xf32>
    %70 = arith.mulf %68, %69 : vector<16x32xf32>
    %71 = vector.broadcast %50 : vector<1x32xf32> to vector<16x32xf32>
    %72 = arith.addf %70, %71 : vector<16x32xf32>
    %c0_46 = arith.constant 0 : index
    %c0_47 = arith.constant 0 : index
    %c0_48 = arith.constant 0 : index
    %73 = vector.load %arg10[%c0_46, %c0_47, %c0_48] : memref<2x32x32xf32, #tpu.memory_space<vmem>>, vector<1x32x32xf32>
    %74 = vector.shape_cast %73 : vector<1x32x32xf32> to vector<32x32xf32>
    %cst_49 = arith.constant dense<0.000000e+00> : vector<16x32xf32>
    %75 = tpu.matmul %72, %74, %cst_49 {dimension_numbers = #tpu.dot_dimension_numbers<[1], [0], [0], [1], [0, 0, 1, 1], [], []>} : vector<16x32xf32>, vector<32x32xf32>, vector<16x32xf32> -> vector<16x32xf32>
    %c0_50 = arith.constant 0 : index
    %c0_51 = arith.constant 0 : index
    %c0_52 = arith.constant 0 : index
    %76 = vector.load %arg11[%c0_50, %c0_51, %c0_52] : memref<2x1x32xf32, #tpu.memory_space<vmem>>, vector<1x1x32xf32>
    %77 = vector.shape_cast %76 : vector<1x1x32xf32> to vector<1x32xf32>
    %78 = vector.broadcast %77 : vector<1x32xf32> to vector<16x32xf32>
    %79 = arith.addf %75, %78 : vector<16x32xf32>
    %80 = arith.addf %72, %79 : vector<16x32xf32>
    %c0_53 = arith.constant 0 : index
    %c0_54 = arith.constant 0 : index
    %c0_55 = arith.constant 0 : index
    %81 = vector.load %arg14[%c0_53, %c0_54, %c0_55] : memref<2x1x32xf32, #tpu.memory_space<vmem>>, vector<1x1x32xf32>
    %82 = vector.shape_cast %81 : vector<1x1x32xf32> to vector<1x32xf32>
    %c0_56 = arith.constant 0 : index
    %c0_57 = arith.constant 0 : index
    %c0_58 = arith.constant 0 : index
    %83 = vector.load %arg15[%c0_56, %c0_57, %c0_58] : memref<2x1x32xf32, #tpu.memory_space<vmem>>, vector<1x1x32xf32>
    %84 = vector.shape_cast %83 : vector<1x1x32xf32> to vector<1x32xf32>
    %cst_59 = arith.constant dense<0.000000e+00> : vector<16xf32>
    %85 = vector.multi_reduction <add>, %80, %cst_59 [1] : vector<16x32xf32> to vector<16xf32>
    %86 = vector.shape_cast %85 : vector<16xf32> to vector<16x1xf32>
    %cst_60 = arith.constant 3.200000e+01 : f32
    %87 = vector.broadcast %cst_60 : f32 to vector<16x1xf32>
    %88 = arith.divf %86, %87 : vector<16x1xf32>
    %89 = vector.broadcast %88 : vector<16x1xf32> to vector<16x32xf32>
    %90 = arith.subf %80, %89 : vector<16x32xf32>
    %91 = arith.mulf %90, %90 : vector<16x32xf32>
    %cst_61 = arith.constant dense<0.000000e+00> : vector<16xf32>
    %92 = vector.multi_reduction <add>, %91, %cst_61 [1] : vector<16x32xf32> to vector<16xf32>
    %93 = vector.shape_cast %92 : vector<16xf32> to vector<16x1xf32>
    %cst_62 = arith.constant 3.200000e+01 : f32
    %94 = vector.broadcast %cst_62 : f32 to vector<16x1xf32>
    %95 = arith.divf %93, %94 : vector<16x1xf32>
    %96 = vector.broadcast %88 : vector<16x1xf32> to vector<16x32xf32>
    %97 = arith.subf %80, %96 : vector<16x32xf32>
    %cst_63 = arith.constant 9.99999974E-6 : f32
    %98 = vector.broadcast %cst_63 : f32 to vector<16x1xf32>
    %99 = arith.addf %95, %98 : vector<16x1xf32>
    %100 = math.rsqrt %99 : vector<16x1xf32>
    %101 = vector.broadcast %100 : vector<16x1xf32> to vector<16x32xf32>
    %102 = arith.mulf %97, %101 : vector<16x32xf32>
    %103 = vector.broadcast %82 : vector<1x32xf32> to vector<16x32xf32>
    %104 = arith.mulf %102, %103 : vector<16x32xf32>
    %105 = vector.broadcast %84 : vector<1x32xf32> to vector<16x32xf32>
    %106 = arith.addf %104, %105 : vector<16x32xf32>
    %c1 = arith.constant 1 : index
    %c0_64 = arith.constant 0 : index
    %c0_65 = arith.constant 0 : index
    %107 = vector.load %arg2[%c1, %c0_64, %c0_65] : memref<2x32x32xf32, #tpu.memory_space<vmem>>, vector<1x32x32xf32>
    %108 = vector.shape_cast %107 : vector<1x32x32xf32> to vector<32x32xf32>
    %cst_66 = arith.constant dense<0.000000e+00> : vector<16x32xf32>
    %109 = tpu.matmul %106, %108, %cst_66 {dimension_numbers = #tpu.dot_dimension_numbers<[1], [0], [0], [1], [0, 0, 1, 1], [], []>} : vector<16x32xf32>, vector<32x32xf32>, vector<16x32xf32> -> vector<16x32xf32>
    %c1_67 = arith.constant 1 : index
    %c0_68 = arith.constant 0 : index
    %c0_69 = arith.constant 0 : index
    %110 = vector.load %arg5[%c1_67, %c0_68, %c0_69] : memref<2x1x32xf32, #tpu.memory_space<vmem>>, vector<1x1x32xf32>
    %111 = vector.shape_cast %110 : vector<1x1x32xf32> to vector<1x32xf32>
    %112 = vector.broadcast %111 : vector<1x32xf32> to vector<16x32xf32>
    %113 = arith.addf %109, %112 : vector<16x32xf32>
    %c1_70 = arith.constant 1 : index
    %c0_71 = arith.constant 0 : index
    %c0_72 = arith.constant 0 : index
    %114 = vector.load %arg3[%c1_70, %c0_71, %c0_72] : memref<2x32x32xf32, #tpu.memory_space<vmem>>, vector<1x32x32xf32>
    %115 = vector.shape_cast %114 : vector<1x32x32xf32> to vector<32x32xf32>
    %cst_73 = arith.constant dense<0.000000e+00> : vector<16x32xf32>
    %116 = tpu.matmul %106, %115, %cst_73 {dimension_numbers = #tpu.dot_dimension_numbers<[1], [0], [0], [1], [0, 0, 1, 1], [], []>} : vector<16x32xf32>, vector<32x32xf32>, vector<16x32xf32> -> vector<16x32xf32>
    %c1_74 = arith.constant 1 : index
    %c0_75 = arith.constant 0 : index
    %c0_76 = arith.constant 0 : index
    %117 = vector.load %arg6[%c1_74, %c0_75, %c0_76] : memref<2x1x32xf32, #tpu.memory_space<vmem>>, vector<1x1x32xf32>
    %118 = vector.shape_cast %117 : vector<1x1x32xf32> to vector<1x32xf32>
    %119 = vector.broadcast %118 : vector<1x32xf32> to vector<16x32xf32>
    %120 = arith.addf %116, %119 : vector<16x32xf32>
    %c1_77 = arith.constant 1 : index
    %c0_78 = arith.constant 0 : index
    %c0_79 = arith.constant 0 : index
    %121 = vector.load %arg4[%c1_77, %c0_78, %c0_79] : memref<2x32x32xf32, #tpu.memory_space<vmem>>, vector<1x32x32xf32>
    %122 = vector.shape_cast %121 : vector<1x32x32xf32> to vector<32x32xf32>
    %cst_80 = arith.constant dense<0.000000e+00> : vector<16x32xf32>
    %123 = tpu.matmul %106, %122, %cst_80 {dimension_numbers = #tpu.dot_dimension_numbers<[1], [0], [0], [1], [0, 0, 1, 1], [], []>} : vector<16x32xf32>, vector<32x32xf32>, vector<16x32xf32> -> vector<16x32xf32>
    %c1_81 = arith.constant 1 : index
    %c0_82 = arith.constant 0 : index
    %c0_83 = arith.constant 0 : index
    %124 = vector.load %arg7[%c1_81, %c0_82, %c0_83] : memref<2x1x32xf32, #tpu.memory_space<vmem>>, vector<1x1x32xf32>
    %125 = vector.shape_cast %124 : vector<1x1x32xf32> to vector<1x32xf32>
    %126 = vector.broadcast %125 : vector<1x32xf32> to vector<16x32xf32>
    %127 = arith.addf %123, %126 : vector<16x32xf32>
    %128 = tpu.transpose %120, [1, 0] : vector<16x32xf32> -> vector<32x16xf32>
    %cst_84 = arith.constant dense<0.000000e+00> : vector<16x16xf32>
    %129 = tpu.matmul %113, %128, %cst_84 {dimension_numbers = #tpu.dot_dimension_numbers<[1], [0], [0], [1], [0, 0, 1, 1], [], []>} : vector<16x32xf32>, vector<32x16xf32>, vector<16x16xf32> -> vector<16x16xf32>
    %cst_85 = arith.constant 0.176776692 : f32
    %130 = vector.broadcast %cst_85 : f32 to vector<16x16xf32>
    %131 = arith.mulf %129, %130 : vector<16x16xf32>
    %132 = arith.addf %131, %1 : vector<16x16xf32>
    %cst_86 = arith.constant dense<0xFF800000> : vector<16xf32>
    %133 = vector.multi_reduction <maximumf>, %132, %cst_86 [1] : vector<16x16xf32> to vector<16xf32>
    %134 = vector.shape_cast %133 : vector<16xf32> to vector<16x1xf32>
    %135 = vector.broadcast %134 : vector<16x1xf32> to vector<16x16xf32>
    %136 = arith.subf %132, %135 : vector<16x16xf32>
    %137 = math.exp %136 : vector<16x16xf32>
    %cst_87 = arith.constant dense<0.000000e+00> : vector<16xf32>
    %138 = vector.multi_reduction <add>, %137, %cst_87 [1] : vector<16x16xf32> to vector<16xf32>
    %139 = vector.shape_cast %138 : vector<16xf32> to vector<16x1xf32>
    %cst_88 = arith.constant dense<0.000000e+00> : vector<16x32xf32>
    %140 = tpu.matmul %137, %127, %cst_88 {dimension_numbers = #tpu.dot_dimension_numbers<[1], [0], [0], [1], [0, 0, 1, 1], [], []>} : vector<16x16xf32>, vector<16x32xf32>, vector<16x32xf32> -> vector<16x32xf32>
    %141 = tpu.reciprocal %139 {approx = true} : vector<16x1xf32> -> vector<16x1xf32>
    %142 = vector.broadcast %141 : vector<16x1xf32> to vector<16x32xf32>
    %143 = arith.mulf %140, %142 : vector<16x32xf32>
    %c1_89 = arith.constant 1 : index
    %c0_90 = arith.constant 0 : index
    %c0_91 = arith.constant 0 : index
    %144 = vector.load %arg8[%c1_89, %c0_90, %c0_91] : memref<2x32x32xf32, #tpu.memory_space<vmem>>, vector<1x32x32xf32>
    %145 = vector.shape_cast %144 : vector<1x32x32xf32> to vector<32x32xf32>
    %cst_92 = arith.constant dense<0.000000e+00> : vector<16x32xf32>
    %146 = tpu.matmul %143, %145, %cst_92 {dimension_numbers = #tpu.dot_dimension_numbers<[1], [0], [0], [1], [0, 0, 1, 1], [], []>} : vector<16x32xf32>, vector<32x32xf32>, vector<16x32xf32> -> vector<16x32xf32>
    %c1_93 = arith.constant 1 : index
    %c0_94 = arith.constant 0 : index
    %c0_95 = arith.constant 0 : index
    %147 = vector.load %arg9[%c1_93, %c0_94, %c0_95] : memref<2x1x32xf32, #tpu.memory_space<vmem>>, vector<1x1x32xf32>
    %148 = vector.shape_cast %147 : vector<1x1x32xf32> to vector<1x32xf32>
    %149 = vector.broadcast %148 : vector<1x32xf32> to vector<16x32xf32>
    %150 = arith.addf %146, %149 : vector<16x32xf32>
    %151 = arith.addf %106, %150 : vector<16x32xf32>
    %c1_96 = arith.constant 1 : index
    %c0_97 = arith.constant 0 : index
    %c0_98 = arith.constant 0 : index
    %152 = vector.load %arg12[%c1_96, %c0_97, %c0_98] : memref<2x1x32xf32, #tpu.memory_space<vmem>>, vector<1x1x32xf32>
    %153 = vector.shape_cast %152 : vector<1x1x32xf32> to vector<1x32xf32>
    %c1_99 = arith.constant 1 : index
    %c0_100 = arith.constant 0 : index
    %c0_101 = arith.constant 0 : index
    %154 = vector.load %arg13[%c1_99, %c0_100, %c0_101] : memref<2x1x32xf32, #tpu.memory_space<vmem>>, vector<1x1x32xf32>
    %155 = vector.shape_cast %154 : vector<1x1x32xf32> to vector<1x32xf32>
    %cst_102 = arith.constant dense<0.000000e+00> : vector<16xf32>
    %156 = vector.multi_reduction <add>, %151, %cst_102 [1] : vector<16x32xf32> to vector<16xf32>
    %157 = vector.shape_cast %156 : vector<16xf32> to vector<16x1xf32>
    %cst_103 = arith.constant 3.200000e+01 : f32
    %158 = vector.broadcast %cst_103 : f32 to vector<16x1xf32>
    %159 = arith.divf %157, %158 : vector<16x1xf32>
    %160 = vector.broadcast %159 : vector<16x1xf32> to vector<16x32xf32>
    %161 = arith.subf %151, %160 : vector<16x32xf32>
    %162 = arith.mulf %161, %161 : vector<16x32xf32>
    %cst_104 = arith.constant dense<0.000000e+00> : vector<16xf32>
    %163 = vector.multi_reduction <add>, %162, %cst_104 [1] : vector<16x32xf32> to vector<16xf32>
    %164 = vector.shape_cast %163 : vector<16xf32> to vector<16x1xf32>
    %cst_105 = arith.constant 3.200000e+01 : f32
    %165 = vector.broadcast %cst_105 : f32 to vector<16x1xf32>
    %166 = arith.divf %164, %165 : vector<16x1xf32>
    %167 = vector.broadcast %159 : vector<16x1xf32> to vector<16x32xf32>
    %168 = arith.subf %151, %167 : vector<16x32xf32>
    %cst_106 = arith.constant 9.99999974E-6 : f32
    %169 = vector.broadcast %cst_106 : f32 to vector<16x1xf32>
    %170 = arith.addf %166, %169 : vector<16x1xf32>
    %171 = math.rsqrt %170 : vector<16x1xf32>
    %172 = vector.broadcast %171 : vector<16x1xf32> to vector<16x32xf32>
    %173 = arith.mulf %168, %172 : vector<16x32xf32>
    %174 = vector.broadcast %153 : vector<1x32xf32> to vector<16x32xf32>
    %175 = arith.mulf %173, %174 : vector<16x32xf32>
    %176 = vector.broadcast %155 : vector<1x32xf32> to vector<16x32xf32>
    %177 = arith.addf %175, %176 : vector<16x32xf32>
    %c1_107 = arith.constant 1 : index
    %c0_108 = arith.constant 0 : index
    %c0_109 = arith.constant 0 : index
    %178 = vector.load %arg10[%c1_107, %c0_108, %c0_109] : memref<2x32x32xf32, #tpu.memory_space<vmem>>, vector<1x32x32xf32>
    %179 = vector.shape_cast %178 : vector<1x32x32xf32> to vector<32x32xf32>
    %cst_110 = arith.constant dense<0.000000e+00> : vector<16x32xf32>
    %180 = tpu.matmul %177, %179, %cst_110 {dimension_numbers = #tpu.dot_dimension_numbers<[1], [0], [0], [1], [0, 0, 1, 1], [], []>} : vector<16x32xf32>, vector<32x32xf32>, vector<16x32xf32> -> vector<16x32xf32>
    %c1_111 = arith.constant 1 : index
    %c0_112 = arith.constant 0 : index
    %c0_113 = arith.constant 0 : index
    %181 = vector.load %arg11[%c1_111, %c0_112, %c0_113] : memref<2x1x32xf32, #tpu.memory_space<vmem>>, vector<1x1x32xf32>
    %182 = vector.shape_cast %181 : vector<1x1x32xf32> to vector<1x32xf32>
    %183 = vector.broadcast %182 : vector<1x32xf32> to vector<16x32xf32>
    %184 = arith.addf %180, %183 : vector<16x32xf32>
    %185 = arith.addf %177, %184 : vector<16x32xf32>
    %c1_114 = arith.constant 1 : index
    %c0_115 = arith.constant 0 : index
    %c0_116 = arith.constant 0 : index
    %186 = vector.load %arg14[%c1_114, %c0_115, %c0_116] : memref<2x1x32xf32, #tpu.memory_space<vmem>>, vector<1x1x32xf32>
    %187 = vector.shape_cast %186 : vector<1x1x32xf32> to vector<1x32xf32>
    %c1_117 = arith.constant 1 : index
    %c0_118 = arith.constant 0 : index
    %c0_119 = arith.constant 0 : index
    %188 = vector.load %arg15[%c1_117, %c0_118, %c0_119] : memref<2x1x32xf32, #tpu.memory_space<vmem>>, vector<1x1x32xf32>
    %189 = vector.shape_cast %188 : vector<1x1x32xf32> to vector<1x32xf32>
    %cst_120 = arith.constant dense<0.000000e+00> : vector<16xf32>
    %190 = vector.multi_reduction <add>, %185, %cst_120 [1] : vector<16x32xf32> to vector<16xf32>
    %191 = vector.shape_cast %190 : vector<16xf32> to vector<16x1xf32>
    %cst_121 = arith.constant 3.200000e+01 : f32
    %192 = vector.broadcast %cst_121 : f32 to vector<16x1xf32>
    %193 = arith.divf %191, %192 : vector<16x1xf32>
    %194 = vector.broadcast %193 : vector<16x1xf32> to vector<16x32xf32>
    %195 = arith.subf %185, %194 : vector<16x32xf32>
    %196 = arith.mulf %195, %195 : vector<16x32xf32>
    %cst_122 = arith.constant dense<0.000000e+00> : vector<16xf32>
    %197 = vector.multi_reduction <add>, %196, %cst_122 [1] : vector<16x32xf32> to vector<16xf32>
    %198 = vector.shape_cast %197 : vector<16xf32> to vector<16x1xf32>
    %cst_123 = arith.constant 3.200000e+01 : f32
    %199 = vector.broadcast %cst_123 : f32 to vector<16x1xf32>
    %200 = arith.divf %198, %199 : vector<16x1xf32>
    %201 = vector.broadcast %193 : vector<16x1xf32> to vector<16x32xf32>
    %202 = arith.subf %185, %201 : vector<16x32xf32>
    %cst_124 = arith.constant 9.99999974E-6 : f32
    %203 = vector.broadcast %cst_124 : f32 to vector<16x1xf32>
    %204 = arith.addf %200, %203 : vector<16x1xf32>
    %205 = math.rsqrt %204 : vector<16x1xf32>
    %206 = vector.broadcast %205 : vector<16x1xf32> to vector<16x32xf32>
    %207 = arith.mulf %202, %206 : vector<16x32xf32>
    %208 = vector.broadcast %187 : vector<1x32xf32> to vector<16x32xf32>
    %209 = arith.mulf %207, %208 : vector<16x32xf32>
    %210 = vector.broadcast %189 : vector<1x32xf32> to vector<16x32xf32>
    %211 = arith.addf %209, %210 : vector<16x32xf32>
    %c0_125 = arith.constant 0 : index
    %c0_126 = arith.constant 0 : index
    %212 = vector.load %arg16[%c0_125, %c0_126] : memref<16x32xf32, #tpu.memory_space<vmem>>, vector<16x32xf32>
    tpu.vector_store %arg16[%c0_125, %c0_126], %211 {strides = array<i32>} : memref<16x32xf32, #tpu.memory_space<vmem>>, vector<16x32xf32>,
    return
  }
}

</mosaic_0001>

<bundles_post_ra>
// kernel: tile.8
= control target key start
LH: loop header
LB: loop body
LE: loop exit
PB: predicated region body
PF: predicated region fallthrough
CT: control target
= control target key end

     0   :  { %s154_s0 = inlined_call_operand.vmem [shape: f32[8,8], index: 0, kind: input, shape index: {}]   ;;  %s155_s1 = inlined_call_operand.vmem [shape: f32[2,8,2,8], index: 1, kind: output, shape index: {}]  }
   0x1   :  { %v4_v0 = vld [vmem:[%s154_s0] ss:$0 sm:$0xff]  ;;  %v51_v1 = vld [vmem:[%s154_s0 + $0x1] ss:$0 sm:$0xff]  ;;  %v54_v2 = vld [vmem:[%s154_s0 + $0x2] ss:$0 sm:$0xff] }
   0x2   :  { %5 = vst [vmem:[%s155_s1] sm:$0x3] %v4_v0  ;;  %50 = vst [vmem:[%s155_s1 + $0x10] sm:$0x3] %v4_v0  ;;  %v57_v3 = vld [vmem:[%s154_s0 + $0x3] ss:$0 sm:$0xff] }
   0x3   :  { %52 = vst [vmem:[%s155_s1 + $0x2] sm:$0x3] %v51_v1  ;;  %53 = vst [vmem:[%s155_s1 + $0x12] sm:$0x3] %v51_v1  ;;  %v60_v4 = vld [vmem:[%s154_s0 + $0x4] ss:$0 sm:$0xff] }
   0x4   :  { %55 = vst [vmem:[%s155_s1 + $0x4] sm:$0x3] %v54_v2  ;;  %56 = vst [vmem:[%s155_s1 + $0x14] sm:$0x3] %v54_v2  ;;  %v63_v5 = vld [vmem:[%s154_s0 + $0x5] ss:$0 sm:$0xff] }
   0x5   :  { %58 = vst [vmem:[%s155_s1 + $0x6] sm:$0x3] %v57_v3  ;;  %59 = vst [vmem:[%s155_s1 + $0x16] sm:$0x3] %v57_v3  ;;  %v66_v6 = vld [vmem:[%s154_s0 + $0x6] ss:$0 sm:$0xff] }
   0x6   :  { %61 = vst [vmem:[%s155_s1 + $0x8] sm:$0x3] %v60_v4  ;;  %62 = vst [vmem:[%s155_s1 + $0x18] sm:$0x3] %v60_v4  ;;  %v69_v7 = vld [vmem:[%s154_s0 + $0x7] ss:$0 sm:$0xff] }
   0x7   :  { %64 = vst [vmem:[%s155_s1 + $0xa] sm:$0x3] %v63_v5  ;;  %65 = vst [vmem:[%s155_s1 + $0x1a] sm:$0x3] %v63_v5 }
   0x8   :  { %67 = vst [vmem:[%s155_s1 + $0xc] sm:$0x3] %v66_v6  ;;  %68 = vst [vmem:[%s155_s1 + $0x1c] sm:$0x3] %v66_v6 }
   0x9   :  { %70 = vst [vmem:[%s155_s1 + $0xe] sm:$0x3] %v69_v7  ;;  %71 = vst [vmem:[%s155_s1 + $0x1e] sm:$0x3] %v69_v7 }

// kernel: tile.9
= control target key start
LH: loop header
LB: loop body
LE: loop exit
PB: predicated region body
PF: predicated region fallthrough
CT: control target
= control target key end

     0   :  { %vm82_vm0 = vcmask 1047556   ;;  %vm84_vm1 = vcmask 64512   ;;  %vm103_vm2 = vcmask 130112   ;;  %s225_s0 = inlined_call_operand.vmem [shape: f32[2,8,2,8], index: 0, kind: input, shape index: {}]   ;;  %s226_s1 = inlined_call_operand.vmem [shape: f32[16,16], index: 1, kind: output, shape index: {}]  }
   0x1   :  { %v138_v0 = vld [vmem:[%s225_s0 + $0xe] sm:$0x3]  ;;  %v139_v1 = vld [vmem:[%s225_s0 + $0xc] sm:$0x3]  ;;  %v140_v2 = vld [vmem:[%s225_s0 + $0xa] sm:$0x3] }
   0x2   :  { %48 = vst [vmem:[#allocation0 + $0x38] sm:$0x3] %v138_v0  ;;  %53 = vst [vmem:[#allocation0 + $0x30] sm:$0x3] %v139_v1  ;;  %v141_v3 = vld [vmem:[%s225_s0 + $0x8] sm:$0x3] }
   0x3   :  { %58 = vst [vmem:[#allocation0 + $0x28] sm:$0x3] %v140_v2  ;;  %v142_v4 = vld [vmem:[%s225_s0 + $0x6] sm:$0x3]  ;;  %v143_v5 = vld [vmem:[%s225_s0 + $0x4] sm:$0x3] }
   0x4   :  { %63 = vst [vmem:[#allocation0 + $0x20] sm:$0x3] %v141_v3  ;;  %68 = vst [vmem:[#allocation0 + $0x18] sm:$0x3] %v142_v4  ;;  %v144_v6 = vld [vmem:[%s225_s0 + $0x2] sm:$0x3] }
   0x5   :  { %73 = vst [vmem:[#allocation0 + $0x10] sm:$0x3] %v143_v5  ;;  %v78_v7 = vld [vmem:[%s225_s0] sm:$0x3]  ;;  %77 = vst [vmem:[#allocation0 + $0x8] sm:$0x3] %v144_v6 }
   0x6   :  { %79 = vst [vmem:[#allocation0] sm:$0x3] %v78_v7  ;;  %v130_v8 = vld [vmem:[%s225_s0 + $0x1e] sm:$0x3]  ;;  %v131_v9 = vld [vmem:[%s225_s0 + $0x1c] sm:$0x3] }
   0x7   :  { %v132_v10 = vld [vmem:[%s225_s0 + $0x1a] sm:$0x3]  ;;  %8 = vst [vmem:[#allocation0 + $0x78] sm:$0x3] %v130_v8  ;;  %13 = vst [vmem:[#allocation0 + $0x70] sm:$0x3] %v131_v9 }
   0x8   :  { %18 = vst [vmem:[#allocation0 + $0x68] sm:$0x3] %v132_v10  ;;  %v133_v11 = vld [vmem:[%s225_s0 + $0x18] sm:$0x3]  ;;  %v134_v12 = vld [vmem:[%s225_s0 + $0x16] sm:$0x3] }
   0x9   :  { %v135_v13 = vld [vmem:[%s225_s0 + $0x14] sm:$0x3]  ;;  %23 = vst [vmem:[#allocation0 + $0x60] sm:$0x3] %v133_v11  ;;  %28 = vst [vmem:[#allocation0 + $0x58] sm:$0x3] %v134_v12 }
   0xa   :  { %33 = vst [vmem:[#allocation0 + $0x50] sm:$0x3] %v135_v13  ;;  %v136_v14 = vld [vmem:[%s225_s0 + $0x12] sm:$0x3]  ;;  %v137_v15 = vld [vmem:[%s225_s0 + $0x10] sm:$0x3] }
   0xb   :  { %38 = vst [vmem:[#allocation0 + $0x48] sm:$0x3] %v136_v14  ;;  %43 = vst [vmem:[#allocation0 + $0x40] sm:$0x3] %v137_v15  ;;  %s148_s0 = smov 8  }
   0xc   :  { %v98_v16 = vld [vmem:[#allocation0 + $0x1] ss:$8 sm:$0xf0]   ;;  %v81_v17 = vld [vmem:[#allocation0] ss:$8 sm:$0xf0]  }
   0xd   :  { %v96_v18 = vld [vmem:[#allocation0 + $0x1] ss:$8 sm:$0xf]   ;;  %v80_v19 = vld [vmem:[#allocation0] ss:$8 sm:$0xf]  }
   0xe   :  { %v100_v20 = vsel %vm82_vm0, %v98_v16, %v96_v18  ;;  %v83_v21 = vsel %vm82_vm0, %v81_v17, %v80_v19 }
   0xf   :  { %101 = vrot.lane.b32.xlu0 %v100_v20, %s148_s0  ;;  %85 = vst.msk [vmem:[%s226_s1] sm:$0xff] %vm84_vm1, %v83_v21  }
  0x10   :  { %v108_v22 = vld [vmem:[#allocation0 + $0x41] ss:$8 sm:$0xf0]   ;;  %v89_v23 = vld [vmem:[#allocation0 + $0x40] ss:$8 sm:$0xf0]  }
  0x12   :  { %v106_v24 = vld [vmem:[#allocation0 + $0x41] ss:$8 sm:$0xf]   ;;  %v87_v25 = vld [vmem:[#allocation0 + $0x40] ss:$8 sm:$0xf]  }
  0x13   :  { %v110_v26 = vsel %vm82_vm0, %v108_v22, %v106_v24  ;;  %v91_v27 = vsel %vm82_vm0, %v89_v23, %v87_v25 }
  0x14   :  { %145 = vst.msk [vmem:[%s226_s1 + $0x8] sm:$0xff] %vm84_vm1, %v91_v27   ;;  %111 = vrot.lane.b32.xlu0 %v110_v26, %s148_s0 }
  0x81   :  { %v102_v28 = vpop.permute.xlu0 %101  }
  0x82   :  { %104 = vst.msk [vmem:[%s226_s1] sm:$0xff] %vm103_vm2, %v102_v28  }
  0x86   :  { %v112_v29 = vpop.permute.xlu0 %111  }
  0x87   :  { %146 = vst.msk [vmem:[%s226_s1 + $0x8] sm:$0xff] %vm103_vm2, %v112_v29  }

// kernel: decode_part_forward.1
= control target key start
LH: loop header
LB: loop body
LE: loop exit
PB: predicated region body
PF: predicated region fallthrough
CT: control target
= control target key end

     0   :  { %vm68_vm0 = vcmask 261120   ;;  %vm413_vm2 = vcmask 130048   ;;  %s2350_s3 = inlined_call_operand.vmem [shape: f32[2,32,32], index: 3, kind: input, shape index: {}]   ;;  %s2351_s0 = inlined_call_operand.vmem [shape: f32[16,32], index: 0, kind: input, shape index: {}]   ;;  %s2352_s2 = inlined_call_operand.vmem [shape: f32[2,32,32], index: 2, kind: input, shape index: {}]   ;;  %s2353_s4 = inlined_call_operand.vmem [shape: f32[2,32,32], index: 4, kind: input, shape index: {}]   ;;  %s2354_s6 = inlined_call_operand.vmem [shape: f32[2,1,32], index: 6, kind: input, shape index: {}]   ;;  %s2355_s5 = inlined_call_operand.vmem [shape: f32[2,1,32], index: 5, kind: input, shape index: {}]   ;;  %s2356_s1 = inlined_call_operand.vmem [shape: f32[16,16], index: 1, kind: input, shape index: {}]   ;;  %s2357_s7 = inlined_call_operand.vmem [shape: f32[2,1,32], index: 7, kind: input, shape index: {}]   ;;  %s2358_s8 = inlined_call_operand.vmem [shape: f32[2,32,32], index: 8, kind: input, shape index: {}]   ;;  %s2359_s9 = inlined_call_operand.vmem [shape: f32[2,1,32], index: 9, kind: input, shape index: {}]   ;;  %s2360_s10 = inlined_call_operand.vmem [shape: f32[2,32,32], index: 10, kind: input, shape index: {}]   ;;  %s2361_s12 = inlined_call_operand.vmem [shape: f32[2,1,32], index: 12, kind: input, shape index: {}]   ;;  %s2362_s13 = inlined_call_operand.vmem [shape: f32[2,1,32], index: 13, kind: input, shape index: {}]   ;;  %s2363_s11 = inlined_call_operand.vmem [shape: f32[2,1,32], index: 11, kind: input, shape index: {}]   ;;  %s2364_s14 = inlined_call_operand.vmem [shape: f32[2,1,32], index: 14, kind: input, shape index: {}]   ;;  %s2365_s15 = inlined_call_operand.vmem [shape: f32[2,1,32], index: 15, kind: input, shape index: {}]   ;;  %s2366_s16 = inlined_call_operand.vmem [shape: f32[16,32], index: 16, kind: output, shape index: {}]  }
   0x1   :  { %2368 = sst [smem:[#allocation2_spill]] %s2350_s3  ;;  %v2073_v5 = vld [vmem:[%s2351_s0] sm:$0xff]  ;;  %v58_v8 = vld [vmem:[%s2352_s2 + $0x8] sm:$0xff]  ;;  %v59_v9 = vld [vmem:[%s2352_s2 + $0x10] sm:$0xff] }
   0x2   :  { %s2369_s23 = sld [smem:[#allocation2_spill]]  ;;  %v57_v6 = vld [vmem:[%s2352_s2] sm:$0xff]  ;;  %1722 = vmatprep.mubr.msk.f32.mxu1 %vm68_vm0, %v2073_v5  ;;  %1711 = vmatprep.mubr.msk.f32.mxu0 %vm68_vm0, %v2073_v5  ;;  %v60_v11 = vld [vmem:[%s2352_s2 + $0x18] sm:$0xff]  ;;  %v2094_v13 = vld [vmem:[%s2351_s0 + $0x8] sm:$0xff] }
   0x3   :  { %v1841_v10 = vpack.c.bf16 %v58_v8, %v57_v6  ;;  %v1845_v12 = vpack.c.bf16 %v60_v11, %v59_v9  ;;  %v236_v14 = vld [vmem:[%s2353_s4] sm:$0xff]  ;;  %v237_v15 = vld [vmem:[%s2353_s4 + $0x8] sm:$0xff]  ;;  %v238_v16 = vld [vmem:[%s2353_s4 + $0x10] sm:$0xff] }
   0x4   :  { %v1857_v17 = vpack.c.bf16 %v237_v15, %v236_v14  ;;  %v239_v18 = vld [vmem:[%s2353_s4 + $0x18] sm:$0xff]  ;;  %v1551_v20 = vld [vmem:[%s2354_s6] ss:$0 sm:$0xff]  ;;  %vm2124_vm1 = vmpackc.low %vm68_vm0, %vm68_vm0 }
   0x5   :  { %1842 = vmatprep.subr.bf16.mxu0 %v1841_v10  ;;  %v1861_v19 = vpack.c.bf16 %v239_v18, %v238_v16  ;;  %v1548_v24 = vld [vmem:[%s2355_s5] ss:$0 sm:$0xff]  ;;  %v2142_v37 = vld [vmem:[%s2356_s1 + $0x8] sm:$0xff]  ;;  %v519_v61 = vld [vmem:[%s2358_s8 + $0x10] sm:$0xff] }
   0x6   :  { %1844 = vmatpush3.bf16.msra.mxu0 %v1841_v10  ;;  %v2137_v34 = vld [vmem:[%s2356_s1] sm:$0xff]  ;;  %v518_v59 = vld [vmem:[%s2358_s8 + $0x8] sm:$0xff]  ;;  %v520_v62 = vld [vmem:[%s2358_s8 + $0x18] sm:$0xff] }
   0x7   :  { %1846 = vmatprep.subr.bf16.mxu0 %v1845_v12  ;;  %v1554_v43 = vld [vmem:[%s2357_s7] ss:$0 sm:$0xff]  ;;  %v1879_v63 = vpack.c.bf16 %v520_v62, %v519_v61 }
   0x8   :  { %v150_v0 = vld [vmem:[%s2369_s23] sm:$0xff]  ;;  %v151_v1 = vld [vmem:[%s2369_s23 + $0x8] sm:$0xff]  ;;  %v152_v2 = vld [vmem:[%s2369_s23 + $0x10] sm:$0xff] }
   0x9   :  { %v1849_v3 = vpack.c.bf16 %v151_v1, %v150_v0  ;;  %v153_v4 = vld [vmem:[%s2369_s23 + $0x18] sm:$0xff]  ;;  %v517_v58 = vld [vmem:[%s2358_s8] sm:$0xff] }
   0xa   :  { %v1853_v7 = vpack.c.bf16 %v153_v4, %v152_v2  ;;  %1848 = vmatpush3.bf16.msra.mxu0 %v1845_v12  ;;  %v1875_v60 = vpack.c.bf16 %v518_v59, %v517_v58  ;;  %v1563_v9 = vld [vmem:[%s2359_s9] ss:$0 sm:$0xff] }
   0xb   :  { %1850 = vmatprep.subr.bf16.mxu1 %v1849_v3  ;;  %1858 = vmatprep.subr.bf16.mxu0 %v1857_v17 }
   0xc   :  { %1852 = vmatpush3.bf16.msra.mxu1 %v1849_v3 }
   0xd   :  { %1854 = vmatprep.subr.bf16.mxu1 %v1853_v7  ;;  %1712 = vmatmul.mubr.msk.f32.vlgmr.msra.gmra.mrb[0].mxu0 %vm68_vm0, %v2094_v13 }
   0xe   :  { %1733 = vmatprep.mubr.msk.f32.mxu0 %vm68_vm0, %v2073_v5  ;;  %1860 = vmatpush3.bf16.msra.mxu0 %v1857_v17 }
   0xf   :  { %1862 = vmatprep.subr.bf16.mxu0 %v1861_v19 }
  0x10   :  { %1856 = vmatpush3.bf16.msra.mxu1 %v1853_v7 }
  0x12   :  { %1864 = vmatpush3.bf16.msra.mxu0 %v1861_v19 }
  0x13   :  { %1723 = vmatmul.mubr.msk.f32.vlgmr.msra.gmra.mrb[0].mxu1 %vm68_vm0, %v2094_v13 }
  0x15   :  { %1734 = vmatmul.mubr.msk.f32.vlgmr.msra.gmra.mrb[2].mxu0 %vm68_vm0, %v2094_v13 }
  0xe0   :  { %v1713_v26 = vpop.f32.mrb[0].mxu0 }
  0xe1   :  { %v141_v28 = vpop.f32.mrb[1].mxu0  ;;  %v147_v31 = vadd.f32 %v1713_v26, %v1548_v24 }
  0xe2   :  { %v142_v30 = vadd.f32 %v1548_v24, %v141_v28 }
  0xe4   :  { %1740 = vmatprep.mubr.msk.f32.mxu1 %vm68_vm0, %v142_v30 }
  0xe6   :  { %v1724_v21 = vpop.f32.mrb[0].mxu1 }
  0xe7   :  { %v233_v22 = vadd.f32 %v1724_v21, %v1551_v20  ;;  %v227_v23 = vpop.f32.mrb[1].mxu1 }
  0xe8   :  { %v228_v25 = vadd.f32 %v1551_v20, %v227_v23  ;;  %v1735_v42 = vpop.f32.mrb[2].mxu0 }
  0xe9   :  { %v313_v44 = vpop.f32.mrb[3].mxu0  ;;  %v319_v45 = vadd.f32 %v1735_v42, %v1554_v43 }
  0xea   :  { %v1865_v29 = vpack.c.bf16 %v233_v22, %v228_v25  ;;  %v314_v46 = vadd.f32 %v1554_v43, %v313_v44  ;;  %v1566_v43 = vld [vmem:[%s2361_s12] ss:$0 sm:$0xff] }
  0xec   :  { %1867 = vmatprep.subr.msk.bf16.mxu1 %vm2124_vm1, %v1865_v29  ;;  %v1871_v47 = vpack.c.bf16 %v319_v45, %v314_v46 }
  0xed   :  { %1870 = vmatpush3.bf16.xpose.msk.msra.mxu1 %vm2124_vm1, %v1865_v29  ;;  %v657_v29 = vld [vmem:[%s2360_s10 + $0x8] sm:$0xff] }
  0xee   :  { %1872 = vmatprep.subr.bf16.mxu0 %v1871_v47  ;;  %1876 = vmatprep.subr.bf16.mxu1 %v1875_v60 }
  0xef   :  { %1874 = vmatpush3.bf16.msra.mxu0 %v1871_v47  ;;  %v1567_v47 = vld [vmem:[%s2362_s13] ss:$0 sm:$0xff] }
  0xf4   :  { %1741 = vmatmul.mubr.msk.f32.vlgmr.msra.gmra.mrb[2].mxu1 %vm68_vm0, %v147_v31  ;;  %v658_v31 = vld [vmem:[%s2360_s10 + $0x10] sm:$0xff] }
  0xf5   :  { %1878 = vmatpush3.bf16.msra.mxu1 %v1875_v60 }
  0xf6   :  { %1880 = vmatprep.subr.bf16.mxu1 %v1879_v63 }
  0xf9   :  { %1882 = vmatpush3.bf16.msra.mxu1 %v1879_v63 }
 0x1c7   :  { %v1742_v32 = vpop.f32.mrb[2].mxu1 }
 0x1c8   :  { %v400_v33 = vpop.f32.mrb[3].mxu1  ;;  %v410_v35 = vmul.f32 0.17677669, %v1742_v32  ;;  %v659_v32 = vld [vmem:[%s2360_s10 + $0x18] sm:$0xff] }
 0x1c9   :  { %v409_v36 = vmul.f32 0.17677669, %v400_v33  ;;  %v1887_v33 = vpack.c.bf16 %v659_v32, %v658_v31 }
 0x1ca   :  { %v412_v40 = vadd.f32 %v410_v35, %v2142_v37 }
 0x1cb   :  { %v411_v38 = vadd.f32 %v409_v36, %v2137_v34 }
 0x1cc   :  { %v417_v41 = vsel %vm413_vm2, %v412_v40, -inf }
 0x1cd   :  { %v414_v39 = vsel %vm413_vm2, %v411_v38, -inf }
 0x1ce   :  { %415 = vmax.xlane.f32.xlu0 %v414_v39 }
 0x1d2   :  { %418 = vmax.xlane.f32.xlu0 %v417_v41 }
 0x25b   :  { %v416_v48 = vpop.xlane.xlu0 %415 }
 0x25c   :  { %v420_v49 = vsub.f32 %v411_v38, %v416_v48 }
 0x25e   :  { %v422_v50 = vmul.f32 1.442695, %v420_v49 }
 0x25f   :  { %v419_v51 = vpop.xlane.xlu0 %418 }
 0x260   :  { %1941 = vpow2.f32 %v422_v50  ;;  %v421_v52 = vsub.f32 %v412_v40, %v419_v51 }
 0x262   :  { %v424_v53 = vmul.f32 1.442695, %v421_v52  ;;  %v1568_v52 = vld [vmem:[%s2363_s11] ss:$0 sm:$0xff] }
 0x264   :  { %1943 = vpow2.f32 %v424_v53 }
 0x26a   :  { %v1942_v54 = vpop.eup %1941 }
 0x26b   :  { %1747 = vmatprep.mubr.msk.f32.mxu0 %vm413_vm2, %v1942_v54  ;;  %v426_v55 = vsel %vm413_vm2, %v1942_v54, 0.0 }
 0x26c   :  { %427 = vadd.xlane.f32.xlu1 %v426_v55 }
 0x26e   :  { %v1944_v56 = vpop.eup %1943 }
 0x26f   :  { %1748 = vmatmul.mubr.msk.f32.vlgmr.msra.gmra.mrb[4].mxu0 %vm413_vm2, %v1944_v56  ;;  %v429_v57 = vsel %vm413_vm2, %v1944_v56, 0.0 }
 0x270   :  { %430 = vadd.xlane.f32.xlu1 %v429_v57 }
 0x2f9   :  { %v428_v0 = vpop.xlane.xlu1 %427 }
 0x2fa   :  { %1945 = vrcp.f32 %v428_v0 }
 0x2fd   :  { %v431_v1 = vpop.xlane.xlu1 %430 }
 0x2fe   :  { %1947 = vrcp.f32 %v431_v1 }
 0x304   :  { %v1946_v3 = vpop.eup %1945 }
 0x308   :  { %v1948_v6 = vpop.eup %1947 }
 0x342   :  { %v1749_v2 = vpop.f32.mrb[4].mxu0 }
 0x343   :  { %v504_v4 = vpop.f32.mrb[5].mxu0  ;;  %v516_v8 = vmul.f32 %v1948_v6, %v1749_v2 }
 0x344   :  { %v515_v7 = vmul.f32 %v1946_v3, %v504_v4 }
 0x346   :  { %1758 = vmatprep.mubr.msk.f32.mxu1 %vm68_vm0, %v515_v7 }
 0x347   :  { %1759 = vmatmul.mubr.msk.f32.vlgmr.msra.gmra.mrb[4].mxu1 %vm68_vm0, %v516_v8  ;;  %v1573_v8 = vld [vmem:[%s2352_s2 + $0x20] sm:$0xff] }
 0x41a   :  { %v1760_v10 = vpop.f32.mrb[4].mxu1 }
 0x41b   :  { %v606_v11 = vadd.f32 %v1760_v10, %v1563_v9  ;;  %v600_v12 = vpop.f32.mrb[5].mxu1 }
 0x41c   :  { %v601_v14 = vadd.f32 %v1563_v9, %v600_v12  ;;  %v1574_v9 = vld [vmem:[%s2352_s2 + $0x28] sm:$0xff] }
 0x41d   :  { %v610_v15 = vadd.f32 %v606_v11, %v2094_v13  ;;  %v1891_v10 = vpack.c.bf16 %v1574_v9, %v1573_v8  ;;  %v1581_v11 = vld [vmem:[%s2369_s23 + $0x20] sm:$0xff]  ;;  %v1582_v12 = vld [vmem:[%s2369_s23 + $0x28] sm:$0xff] }
 0x41e   :  { %v609_v16 = vadd.f32 %v601_v14, %v2073_v5  ;;  %v656_v5 = vld [vmem:[%s2360_s10] sm:$0xff]  ;;  %v1899_v14 = vpack.c.bf16 %v1582_v12, %v1581_v11 }
 0x41f   :  { %v616_v17 = vsel %vm68_vm0, %v610_v15, 0.0  ;;  %v1883_v30 = vpack.c.bf16 %v657_v29, %v656_v5  ;;  %1892 = vmatprep.subr.bf16.mxu1 %v1891_v10 }
 0x420   :  { %617 = vadd.xlane.f32.xlu1 %v616_v17  ;;  %v613_v18 = vsel %vm68_vm0, %v609_v16, 0.0  ;;  %1894 = vmatpush3.bf16.msra.mxu1 %v1891_v10  ;;  %v1583_v17 = vld [vmem:[%s2369_s23 + $0x30] sm:$0xff] }
 0x421   :  { %614 = vadd.xlane.f32.xlu0 %v613_v18  ;;  %1884 = vmatprep.subr.bf16.mxu0 %v1883_v30 }
 0x422   :  { %1886 = vmatpush3.bf16.msra.mxu0 %v1883_v30  ;;  %v1571_v30 = vld [vmem:[%s2364_s14] ss:$0 sm:$0xff] }
 0x423   :  { %1888 = vmatprep.subr.bf16.mxu0 %v1887_v33 }
 0x426   :  { %1890 = vmatpush3.bf16.msra.mxu0 %v1887_v33 }
 0x427   :  { %1900 = vmatprep.subr.bf16.mxu0 %v1899_v14 }
 0x4ad   :  { %v618_v19 = vpop.xlane.xlu1 %617 }
 0x4ae   :  { %v621_v20 = vmul.f32 0.03125, %v618_v19  ;;  %v615_v21 = vpop.xlane.xlu0 %614  ;;  %v1584_v19 = vld [vmem:[%s2369_s23 + $0x38] sm:$0xff] }
 0x4af   :  { %v620_v22 = vmul.f32 0.03125, %v615_v21  ;;  %v1589_v21 = vld [vmem:[%s2353_s4 + $0x20] sm:$0xff] }
 0x4b0   :  { %v623_v23 = vsub.f32 %v610_v15, %v621_v20  ;;  %v1575_v15 = vld [vmem:[%s2352_s2 + $0x30] sm:$0xff]  ;;  %v1903_v20 = vpack.c.bf16 %v1584_v19, %v1583_v17 }
 0x4b1   :  { %v622_v24 = vsub.f32 %v609_v16, %v620_v22  ;;  %v1576_v16 = vld [vmem:[%s2352_s2 + $0x38] sm:$0xff]  ;;  %v1590_v22 = vld [vmem:[%s2353_s4 + $0x28] sm:$0xff]  ;;  %v1605_v17 = vld [vmem:[%s2358_s8 + $0x30] sm:$0xff] }
 0x4b2   :  { %v625_v25 = vmul.f32 %v623_v23, %v623_v23  ;;  %v1895_v18 = vpack.c.bf16 %v1576_v16, %v1575_v15  ;;  %v1604_v15 = vld [vmem:[%s2358_s8 + $0x28] sm:$0xff] }
 0x4b3   :  { %v624_v26 = vmul.f32 %v622_v24, %v622_v24 }
 0x4b4   :  { %v629_v28 = vsel %vm68_vm0, %v625_v25, 0.0  ;;  %1896 = vmatprep.subr.bf16.mxu1 %v1895_v18 }
 0x4b5   :  { %630 = vadd.xlane.f32.xlu1 %v629_v28  ;;  %v626_v13 = vsel %vm68_vm0, %v624_v26, 0.0  ;;  %1898 = vmatpush3.bf16.msra.mxu1 %v1895_v18  ;;  %v1606_v18 = vld [vmem:[%s2358_s8 + $0x38] sm:$0xff] }
 0x4b6   :  { %627 = vadd.xlane.f32.xlu0 %v626_v13  ;;  %v1929_v19 = vpack.c.bf16 %v1606_v18, %v1605_v17 }
 0x542   :  { %v631_v35 = vpop.xlane.xlu1 %630 }
 0x543   :  { %v633_v36 = vmul.f32 0.03125, %v631_v35  ;;  %v628_v38 = vpop.xlane.xlu0 %627  ;;  %v1572_v35 = vld [vmem:[%s2365_s15] ss:$0 sm:$0xff] }
 0x544   :  { %v632_v39 = vmul.f32 0.03125, %v628_v38 }
 0x545   :  { %v635_v40 = vadd.f32 1e-05, %v633_v36 }
 0x546   :  { %v634_v41 = vadd.f32 1e-05, %v632_v39  ;;  %v1591_v39 = vld [vmem:[%s2353_s4 + $0x30] sm:$0xff] }
 0x547   :  { %1949 = vrsqrt.f32 %v635_v40  ;;  %v1592_v40 = vld [vmem:[%s2353_s4 + $0x38] sm:$0xff] }
 0x548   :  { %1951 = vrsqrt.f32 %v634_v41 }
 0x551   :  { %v1950_v42 = vpop.eup %1949 }
 0x552   :  { %v1952_v44 = vpop.eup %1951  ;;  %v639_v45 = vmul.f32 %v1950_v42, %v623_v23  ;;  %v1907_v23 = vpack.c.bf16 %v1590_v22, %v1589_v21 }
 0x553   :  { %v638_v46 = vmul.f32 %v1952_v44, %v622_v24  ;;  %v1586_v44 = vld [vmem:[%s2354_s6 + $0x1] ss:$0 sm:$0xff] }
 0x554   :  { %v647_v48 = vmul.f32 %v1566_v43, %v639_v45  ;;  %1908 = vmatprep.subr.bf16.mxu1 %v1907_v23  ;;  %v1578_v45 = vld [vmem:[%s2355_s5 + $0x1] ss:$0 sm:$0xff] }
 0x555   :  { %v646_v49 = vmul.f32 %v1566_v43, %v638_v46  ;;  %v1911_v43 = vpack.c.bf16 %v1592_v40, %v1591_v39 }
 0x556   :  { %v655_v51 = vadd.f32 %v1567_v47, %v647_v48 }
 0x557   :  { %v654_v50 = vadd.f32 %v1567_v47, %v646_v49 }
 0x559   :  { %1769 = vmatprep.mubr.msk.f32.mxu0 %vm68_vm0, %v654_v50 }
 0x55a   :  { %1770 = vmatmul.mubr.msk.f32.vlgmr.msra.gmra.mrb[6].mxu0 %vm68_vm0, %v655_v51 }
 0x55b   :  { %1902 = vmatpush3.bf16.msra.mxu0 %v1899_v14  ;;  %v1603_v14 = vld [vmem:[%s2358_s8 + $0x20] sm:$0xff] }
 0x55c   :  { %1904 = vmatprep.subr.bf16.mxu0 %v1903_v20  ;;  %v1925_v16 = vpack.c.bf16 %v1604_v15, %v1603_v14 }
 0x55f   :  { %1906 = vmatpush3.bf16.msra.mxu0 %v1903_v20 }
 0x62d   :  { %v1771_v53 = vpop.f32.mrb[6].mxu0 }
 0x62e   :  { %v745_v54 = vadd.f32 %v1771_v53, %v1568_v52  ;;  %v739_v55 = vpop.f32.mrb[7].mxu0 }
 0x62f   :  { %v740_v56 = vadd.f32 %v1568_v52, %v739_v55 }
 0x630   :  { %v749_v57 = vadd.f32 %v745_v54, %v655_v51  ;;  %v1594_v54 = vld [vmem:[%s2357_s7 + $0x1] ss:$0 sm:$0xff] }
 0x631   :  { %v748_v58 = vadd.f32 %v740_v56, %v654_v50 }
 0x632   :  { %v755_v59 = vsel %vm68_vm0, %v749_v57, 0.0 }
 0x633   :  { %756 = vadd.xlane.f32.xlu1 %v755_v59  ;;  %v752_v60 = vsel %vm68_vm0, %v748_v58, 0.0 }
 0x634   :  { %753 = vadd.xlane.f32.xlu0 %v752_v60 }
 0x6c0   :  { %v757_v61 = vpop.xlane.xlu1 %756 }
 0x6c1   :  { %v759_v62 = vmul.f32 0.03125, %v757_v61  ;;  %v754_v63 = vpop.xlane.xlu0 %753 }
 0x6c2   :  { %v758_v0 = vmul.f32 0.03125, %v754_v63 }
 0x6c3   :  { %v761_v1 = vsub.f32 %v749_v57, %v759_v62 }
 0x6c4   :  { %v760_v2 = vsub.f32 %v748_v58, %v758_v0 }
 0x6c5   :  { %v763_v3 = vmul.f32 %v761_v1, %v761_v1 }
 0x6c6   :  { %v762_v4 = vmul.f32 %v760_v2, %v760_v2 }
 0x6c7   :  { %v767_v6 = vsel %vm68_vm0, %v763_v3, 0.0 }
 0x6c8   :  { %768 = vadd.xlane.f32.xlu1 %v767_v6  ;;  %v764_v7 = vsel %vm68_vm0, %v762_v4, 0.0 }
 0x6c9   :  { %765 = vadd.xlane.f32.xlu0 %v764_v7 }
 0x755   :  { %v769_v24 = vpop.xlane.xlu1 %768 }
 0x756   :  { %v771_v25 = vmul.f32 0.03125, %v769_v24  ;;  %v766_v26 = vpop.xlane.xlu0 %765 }
 0x757   :  { %v770_v28 = vmul.f32 0.03125, %v766_v26 }
 0x758   :  { %v773_v13 = vadd.f32 1e-05, %v771_v25 }
 0x759   :  { %v772_v5 = vadd.f32 1e-05, %v770_v28 }
 0x75a   :  { %1953 = vrsqrt.f32 %v773_v13  ;;  %v1608_v13 = vld [vmem:[%s2359_s9 + $0x1] ss:$0 sm:$0xff] }
 0x75b   :  { %1955 = vrsqrt.f32 %v772_v5 }
 0x764   :  { %v1954_v29 = vpop.eup %1953 }
 0x765   :  { %v1956_v31 = vpop.eup %1955  ;;  %v777_v32 = vmul.f32 %v1954_v29, %v761_v1 }
 0x766   :  { %v776_v33 = vmul.f32 %v1956_v31, %v760_v2 }
 0x767   :  { %v785_v36 = vmul.f32 %v1571_v30, %v777_v32 }
 0x768   :  { %v784_v38 = vmul.f32 %v1571_v30, %v776_v33 }
 0x769   :  { %v2249_v42 = vadd.f32 %v1572_v35, %v785_v36 }
 0x76a   :  { %v2247_v41 = vadd.f32 %v1572_v35, %v784_v38 }
 0x76c   :  { %1780 = vmatprep.mubr.msk.f32.mxu1 %vm68_vm0, %v2247_v41  ;;  %1791 = vmatprep.mubr.msk.f32.mxu0 %vm68_vm0, %v2247_v41 }
 0x76d   :  { %1781 = vmatmul.mubr.msk.f32.vlgmr.msra.gmra.mrb[6].mxu1 %vm68_vm0, %v2249_v42  ;;  %1792 = vmatmul.mubr.msk.f32.vlgmr.msra.gmra.mrb[8].mxu0 %vm68_vm0, %v2249_v42 }
 0x76e   :  { %1910 = vmatpush3.bf16.msra.mxu1 %v1907_v23  ;;  %1802 = vmatprep.mubr.msk.f32.mxu1 %vm68_vm0, %v2247_v41 }
 0x76f   :  { %1912 = vmatprep.subr.bf16.mxu1 %v1911_v43 }
 0x772   :  { %1914 = vmatpush3.bf16.msra.mxu1 %v1911_v43 }
 0x775   :  { %1803 = vmatmul.mubr.msk.f32.vlgmr.msra.gmra.mrb[8].mxu1 %vm68_vm0, %v2249_v42 }
 0x840   :  { %v1782_v46 = vpop.f32.mrb[6].mxu1  ;;  %v1793_v47 = vpop.f32.mrb[8].mxu0 }
 0x841   :  { %v973_v48 = vadd.f32 %v1793_v47, %v1586_v44  ;;  %v879_v49 = vpop.f32.mrb[7].mxu1  ;;  %v967_v50 = vpop.f32.mrb[9].mxu0  ;;  %v885_v59 = vadd.f32 %v1782_v46, %v1578_v45 }
 0x842   :  { %v880_v51 = vadd.f32 %v1578_v45, %v879_v49  ;;  %v968_v52 = vadd.f32 %v1586_v44, %v967_v50  ;;  %v1616_v49 = vld [vmem:[%s2360_s10 + $0x28] sm:$0xff] }
 0x844   :  { %v1915_v53 = vpack.c.bf16 %v973_v48, %v968_v52  ;;  %1809 = vmatprep.mubr.msk.f32.mxu0 %vm68_vm0, %v880_v51  ;;  %v1617_v51 = vld [vmem:[%s2360_s10 + $0x30] sm:$0xff]  ;;  %v1618_v52 = vld [vmem:[%s2360_s10 + $0x38] sm:$0xff] }
 0x846   :  { %1917 = vmatprep.subr.msk.bf16.mxu0 %vm2124_vm1, %v1915_v53 }
 0x847   :  { %1920 = vmatpush3.bf16.xpose.msk.msra.mxu0 %vm2124_vm1, %v1915_v53  ;;  %v1937_v53 = vpack.c.bf16 %v1618_v52, %v1617_v51 }
 0x848   :  { %v1804_v55 = vpop.f32.mrb[8].mxu1  ;;  %1926 = vmatprep.subr.bf16.mxu0 %v1925_v16 }
 0x849   :  { %v1061_v56 = vadd.f32 %v1804_v55, %v1594_v54  ;;  %v1055_v57 = vpop.f32.mrb[9].mxu1 }
 0x84a   :  { %v1056_v58 = vadd.f32 %v1594_v54, %v1055_v57 }
 0x84c   :  { %v1921_v60 = vpack.c.bf16 %v1061_v56, %v1056_v58 }
 0x84e   :  { %1922 = vmatprep.subr.bf16.mxu1 %v1921_v60  ;;  %1810 = vmatmul.mubr.msk.f32.vlgmr.msra.gmra.mrb[10].mxu0 %vm68_vm0, %v885_v59 }
 0x84f   :  { %1924 = vmatpush3.bf16.msra.mxu1 %v1921_v60  ;;  %1928 = vmatpush3.bf16.msra.mxu0 %v1925_v16 }
 0x850   :  { %1930 = vmatprep.subr.bf16.mxu0 %v1929_v19 }
 0x853   :  { %1932 = vmatpush3.bf16.msra.mxu0 %v1929_v19 }
 0x921   :  { %v1811_v61 = vpop.f32.mrb[10].mxu0 }
 0x922   :  { %v1152_v62 = vmul.f32 0.17677669, %v1811_v61  ;;  %v1142_v63 = vpop.f32.mrb[11].mxu0  ;;  %v1613_v61 = vld [vmem:[%s2361_s12 + $0x1] ss:$0 sm:$0xff] }
 0x923   :  { %v1151_v0 = vmul.f32 0.17677669, %v1142_v63 }
 0x924   :  { %v1154_v1 = vadd.f32 %v1152_v62, %v2142_v37 }
 0x925   :  { %v1153_v2 = vadd.f32 %v1151_v0, %v2137_v34 }
 0x926   :  { %v1158_v27 = vsel %vm413_vm2, %v1154_v1, -inf }
 0x927   :  { %1159 = vmax.xlane.f32.xlu1 %v1158_v27  ;;  %v1155_v3 = vsel %vm413_vm2, %v1153_v2, -inf }
 0x928   :  { %1156 = vmax.xlane.f32.xlu0 %v1155_v3 }
 0x9b4   :  { %v1160_v4 = vpop.xlane.xlu1 %1159 }
 0x9b5   :  { %v1162_v6 = vsub.f32 %v1154_v1, %v1160_v4  ;;  %v1157_v7 = vpop.xlane.xlu0 %1156  ;;  %v1614_v1 = vld [vmem:[%s2362_s13 + $0x1] ss:$0 sm:$0xff] }
 0x9b6   :  { %v1161_v8 = vsub.f32 %v1153_v2, %v1157_v7 }
 0x9b7   :  { %v1165_v9 = vmul.f32 1.442695, %v1162_v6  ;;  %v1620_v6 = vld [vmem:[%s2363_s11 + $0x1] ss:$0 sm:$0xff] }
 0x9b8   :  { %v1163_v10 = vmul.f32 1.442695, %v1161_v8 }
 0x9b9   :  { %1957 = vpow2.f32 %v1165_v9 }
 0x9ba   :  { %1959 = vpow2.f32 %v1163_v10 }
 0x9c3   :  { %v1958_v11 = vpop.eup %1957 }
 0x9c4   :  { %v1960_v12 = vpop.eup %1959  ;;  %v1170_v37 = vsel %vm413_vm2, %v1958_v11, 0.0 }
 0x9c5   :  { %1171 = vadd.xlane.f32.xlu1 %v1170_v37  ;;  %1816 = vmatprep.mubr.msk.f32.mxu1 %vm413_vm2, %v1960_v12  ;;  %v1167_v34 = vsel %vm413_vm2, %v1960_v12, 0.0 }
 0x9c6   :  { %1817 = vmatmul.mubr.msk.f32.vlgmr.msra.gmra.mrb[10].mxu1 %vm413_vm2, %v1958_v11  ;;  %1168 = vadd.xlane.f32.xlu0 %v1167_v34 }
 0xa52   :  { %v1172_v21 = vpop.xlane.xlu1 %1171 }
 0xa53   :  { %v1169_v20 = vpop.xlane.xlu0 %1168 }
 0xa54   :  { %1961 = vrcp.f32 %v1169_v20 }
 0xa55   :  { %1963 = vrcp.f32 %v1172_v21 }
 0xa5e   :  { %v1962_v23 = vpop.eup %1961 }
 0xa5f   :  { %v1964_v25 = vpop.eup %1963 }
 0xa99   :  { %v1818_v22 = vpop.f32.mrb[10].mxu1 }
 0xa9a   :  { %v1245_v24 = vpop.f32.mrb[11].mxu1  ;;  %v1257_v28 = vmul.f32 %v1964_v25, %v1818_v22 }
 0xa9b   :  { %v1256_v26 = vmul.f32 %v1962_v23, %v1245_v24 }
 0xa9d   :  { %1827 = vmatprep.mubr.msk.f32.mxu0 %vm68_vm0, %v1256_v26 }
 0xa9e   :  { %1828 = vmatmul.mubr.msk.f32.vlgmr.msra.gmra.mrb[12].mxu0 %vm68_vm0, %v1257_v28 }
 0xb71   :  { %v1829_v5 = vpop.f32.mrb[12].mxu0 }
 0xb72   :  { %v1349_v29 = vadd.f32 %v1829_v5, %v1608_v13  ;;  %v1343_v30 = vpop.f32.mrb[13].mxu0 }
 0xb73   :  { %v1344_v31 = vadd.f32 %v1608_v13, %v1343_v30  ;;  %v1625_v30 = vld [vmem:[%s2364_s14 + $0x1] ss:$0 sm:$0xff] }
 0xb74   :  { %v1353_v32 = vadd.f32 %v1349_v29, %v2249_v42 }
 0xb75   :  { %v1352_v33 = vadd.f32 %v1344_v31, %v2247_v41  ;;  %v1615_v41 = vld [vmem:[%s2360_s10 + $0x20] sm:$0xff] }
 0xb76   :  { %v1361_v35 = vsel %vm68_vm0, %v1353_v32, 0.0  ;;  %v1933_v50 = vpack.c.bf16 %v1616_v49, %v1615_v41 }
 0xb77   :  { %1362 = vadd.xlane.f32.xlu1 %v1361_v35  ;;  %v1358_v36 = vsel %vm68_vm0, %v1352_v33, 0.0 }
 0xb78   :  { %1359 = vadd.xlane.f32.xlu0 %v1358_v36  ;;  %1934 = vmatprep.subr.bf16.mxu1 %v1933_v50 }
 0xb79   :  { %1936 = vmatpush3.bf16.msra.mxu1 %v1933_v50 }
 0xb7a   :  { %1938 = vmatprep.subr.bf16.mxu1 %v1937_v53 }
 0xb7d   :  { %1940 = vmatpush3.bf16.msra.mxu1 %v1937_v53 }
 0xc04   :  { %v1363_v38 = vpop.xlane.xlu1 %1362 }
 0xc05   :  { %v1365_v39 = vmul.f32 0.03125, %v1363_v38  ;;  %v1360_v40 = vpop.xlane.xlu0 %1359 }
 0xc06   :  { %v1364_v43 = vmul.f32 0.03125, %v1360_v40 }
 0xc07   :  { %v1367_v44 = vsub.f32 %v1353_v32, %v1365_v39 }
 0xc08   :  { %v1366_v45 = vsub.f32 %v1352_v33, %v1364_v43  ;;  %v1626_v33 = vld [vmem:[%s2365_s15 + $0x1] ss:$0 sm:$0xff] }
 0xc09   :  { %v1369_v46 = vmul.f32 %v1367_v44, %v1367_v44 }
 0xc0a   :  { %v1368_v47 = vmul.f32 %v1366_v45, %v1366_v45 }
 0xc0b   :  { %v1373_v48 = vsel %vm68_vm0, %v1369_v46, 0.0 }
 0xc0c   :  { %1374 = vadd.xlane.f32.xlu1 %v1373_v48  ;;  %v1370_v42 = vsel %vm68_vm0, %v1368_v47, 0.0 }
 0xc0d   :  { %1371 = vadd.xlane.f32.xlu0 %v1370_v42 }
 0xc99   :  { %v1375_v54 = vpop.xlane.xlu1 %1374 }
 0xc9a   :  { %v1377_v55 = vmul.f32 0.03125, %v1375_v54  ;;  %v1372_v56 = vpop.xlane.xlu0 %1371 }
 0xc9b   :  { %v1376_v57 = vmul.f32 0.03125, %v1372_v56 }
 0xc9c   :  { %v1379_v58 = vadd.f32 1e-05, %v1377_v55 }
 0xc9d   :  { %v1378_v59 = vadd.f32 1e-05, %v1376_v57 }
 0xc9e   :  { %1965 = vrsqrt.f32 %v1379_v58 }
 0xc9f   :  { %1967 = vrsqrt.f32 %v1378_v59 }
 0xca8   :  { %v1966_v60 = vpop.eup %1965 }
 0xca9   :  { %v1968_v62 = vpop.eup %1967  ;;  %v1383_v63 = vmul.f32 %v1966_v60, %v1367_v44 }
 0xcaa   :  { %v1382_v0 = vmul.f32 %v1968_v62, %v1366_v45 }
 0xcab   :  { %v1391_v2 = vmul.f32 %v1613_v61, %v1383_v63 }
 0xcac   :  { %v1390_v27 = vmul.f32 %v1613_v61, %v1382_v0 }
 0xcad   :  { %v1399_v4 = vadd.f32 %v1614_v1, %v1391_v2 }
 0xcae   :  { %v1398_v3 = vadd.f32 %v1614_v1, %v1390_v27 }
 0xcb0   :  { %1838 = vmatprep.mubr.msk.f32.mxu1 %vm68_vm0, %v1398_v3 }
 0xcb1   :  { %1839 = vmatmul.mubr.msk.f32.vlgmr.msra.gmra.mrb[12].mxu1 %vm68_vm0, %v1399_v4 }
 0xd84   :  { %v1840_v7 = vpop.f32.mrb[12].mxu1 }
 0xd85   :  { %v1491_v8 = vadd.f32 %v1840_v7, %v1620_v6  ;;  %v1485_v9 = vpop.f32.mrb[13].mxu1 }
 0xd86   :  { %v1486_v10 = vadd.f32 %v1620_v6, %v1485_v9 }
 0xd87   :  { %v1495_v11 = vadd.f32 %v1491_v8, %v1399_v4 }
 0xd88   :  { %v1494_v12 = vadd.f32 %v1486_v10, %v1398_v3 }
 0xd89   :  { %v1503_v37 = vsel %vm68_vm0, %v1495_v11, 0.0 }
 0xd8a   :  { %1504 = vadd.xlane.f32.xlu1 %v1503_v37  ;;  %v1500_v34 = vsel %vm68_vm0, %v1494_v12, 0.0 }
 0xd8b   :  { %1501 = vadd.xlane.f32.xlu0 %v1500_v34 }
 0xe17   :  { %v1505_v14 = vpop.xlane.xlu1 %1504 }
 0xe18   :  { %v1507_v15 = vmul.f32 0.03125, %v1505_v14  ;;  %v1502_v16 = vpop.xlane.xlu0 %1501 }
 0xe19   :  { %v1506_v17 = vmul.f32 0.03125, %v1502_v16 }
 0xe1a   :  { %v1509_v18 = vsub.f32 %v1495_v11, %v1507_v15 }
 0xe1b   :  { %v1508_v19 = vsub.f32 %v1494_v12, %v1506_v17 }
 0xe1c   :  { %v1511_v20 = vmul.f32 %v1509_v18, %v1509_v18 }
 0xe1d   :  { %v1510_v21 = vmul.f32 %v1508_v19, %v1508_v19 }
 0xe1e   :  { %v1515_v22 = vsel %vm68_vm0, %v1511_v20, 0.0 }
 0xe1f   :  { %1516 = vadd.xlane.f32.xlu1 %v1515_v22  ;;  %v1512_v23 = vsel %vm68_vm0, %v1510_v21, 0.0 }
 0xe20   :  { %1513 = vadd.xlane.f32.xlu0 %v1512_v23 }
 0xeac   :  { %v1517_v24 = vpop.xlane.xlu1 %1516 }
 0xead   :  { %v1519_v25 = vmul.f32 0.03125, %v1517_v24  ;;  %v1514_v26 = vpop.xlane.xlu0 %1513 }
 0xeae   :  { %v1518_v28 = vmul.f32 0.03125, %v1514_v26 }
 0xeaf   :  { %v1521_v13 = vadd.f32 1e-05, %v1519_v25 }
 0xeb0   :  { %v1520_v5 = vadd.f32 1e-05, %v1518_v28 }
 0xeb1   :  { %1969 = vrsqrt.f32 %v1521_v13 }
 0xeb2   :  { %1971 = vrsqrt.f32 %v1520_v5 }
 0xebb   :  { %v1970_v29 = vpop.eup %1969 }
 0xebc   :  { %v1972_v31 = vpop.eup %1971  ;;  %v1525_v32 = vmul.f32 %v1970_v29, %v1509_v18 }
 0xebd   :  { %v1524_v35 = vmul.f32 %v1972_v31, %v1508_v19 }
 0xebe   :  { %v1533_v36 = vmul.f32 %v1625_v30, %v1525_v32 }
 0xebf   :  { %v1532_v38 = vmul.f32 %v1625_v30, %v1524_v35 }
 0xec0   :  { %v1541_v39 = vadd.f32 %v1626_v33, %v1533_v36 }
 0xec1   :  { %v1540_v40 = vadd.f32 %v1626_v33, %v1532_v38 }
 0xec2   :  { %1543 = vst.msk [vmem:[%s2366_s16 + $0x8] sm:$0xff] %vm68_vm0, %v1541_v39 }
 0xec3   :  { %1542 = vst.msk [vmem:[%s2366_s16] sm:$0xff] %vm68_vm0, %v1540_v40 }

</bundles_post_ra>
